<compile_context>
chip_gen: v7x
topology: tpu7x:2x2x1
jax: 0.10.0
libtpu: 0.0.40
codegen_flags: <defaults>
</compile_context>

<pallas_src>
import numpy as np
import jax
import jax.numpy as jnp
from jax.experimental import pallas as pl
from jax.experimental.pallas import tpu as pltpu

# ---- deterministic "parameters" exactly as in ConverterTorch.__init__ ----
PIXELS_PER_WORLD = 5
W_IMG = 384.0
H_IMG = 160.0
FOV = 90.0
F = W_IMG / (2.0 * np.tan(FOV * np.pi / 360.0))   # = 192.0
MAP_SIZE = 192
HACK = 3.0
CAM_HEIGHT = 1.4
METERS_PER_PIXEL = 1.0 / PIXELS_PER_WORLD          # 0.2
POS_MAP_X = float(MAP_SIZE // 2)                   # 96.0
POS_MAP_Y = float(MAP_SIZE)                        # 192.0
# A = [[F, 0, W/2], [0, F, H/2], [0, 0, 1]]  (used in expanded form below)

LANES = 128
MAX_TILE_R = 512    # (2, 512, 128) f32 block = 512 KiB; in+out double-buffered
                    # = 2 MiB -> safely under v5e's 16 MiB scoped VMEM default.


def _converter_kernel(xy_ref, out_ref):
    # xy_ref / out_ref: (2, TILE_R, 128) f32.  Plane 0 = x, plane 1 = y.
    px = xy_ref[0]                       # (TILE_R, 128) full-tile load
    py = xy_ref[1]

    # map_to_world: subtract pos_map, flip y, scale to meters.
    wx = (px - POS_MAP_X) * METERS_PER_PIXEL
    wy = (POS_MAP_Y - py) * METERS_PER_PIXEL

    # world_to_cam: xyz = [wx, cam_height, wy + hack];  result = xyz @ A.T
    #   r0 = F*wx          + (W/2)*(wy+hack)
    #   r1 = F*cam_height  + (H/2)*(wy+hack)
    #   r2 = (wy+hack)
    yh = wy + HACK
    inv = 1.0 / yh                       # one exact reciprocal, reused twice
    r0 = F * wx + (W_IMG * 0.5) * yh
    r1 = F * CAM_HEIGHT + (H_IMG * 0.5) * yh

    out_ref[0] = jnp.clip(r0 * inv, 0.0, W_IMG)
    out_ref[1] = jnp.clip(r1 * inv, 0.0, H_IMG)


@jax.jit
def converter_forward(map_coords):
    """JAX/Pallas equivalent of ConverterTorch.forward.  map_coords: (..., 2)."""
    orig_shape = map_coords.shape
    assert orig_shape[-1] == 2
    flat = map_coords.reshape(-1, 2).astype(jnp.float32)     # (N, 2)
    n = flat.shape[0]

    # Row-plane sizing: Rpad rows of 128 lanes, Rpad a multiple of tile_r (>=8).
    r = max(1, -(-n // LANES))
    tile_r = min(MAX_TILE_R, ((r + 7) // 8) * 8)
    r_pad = ((r + tile_r - 1) // tile_r) * tile_r
    n_pad = r_pad * LANES

    # Single transpose + pad + reshape (fused by XLA under jit); no zero-slab
    # write-then-overwrite.  Padding value 0 keeps yh = 41.4 > 0 (safe divide).
    xy = jnp.pad(flat.T, ((0, 0), (0, n_pad - n)))            # (2, n_pad)
    xy = xy.reshape(2, r_pad, LANES)

    out = pl.pallas_call(
        _converter_kernel,
        out_shape=jax.ShapeDtypeStruct((2, r_pad, LANES), jnp.float32),
        grid=(r_pad // tile_r,),
        in_specs=[pl.BlockSpec((2, tile_r, LANES), lambda i: (0, i, 0))],
        out_specs=pl.BlockSpec((2, tile_r, LANES), lambda i: (0, i, 0)),
        compiler_params=pltpu.CompilerParams(
            dimension_semantics=("parallel",)),
    )(xy)

    uv = out.reshape(2, n_pad)[:, :n].T                       # (N, 2)
    return uv.reshape(orig_shape)


def _reference_forward(map_coords):
    """Pure-JAX reference mirroring the PyTorch code path."""
    mc = map_coords.astype(jnp.float32)
    pos_map = jnp.array([POS_MAP_X, POS_MAP_Y], jnp.float32)
    rel = mc - pos_map
    rel = rel.at[..., 1].multiply(-1.0)
    world = rel * METERS_PER_PIXEL
    wx = world[..., 0].reshape(-1)
    wy = world[..., 1].reshape(-1) + HACK
    wz = jnp.full_like(wx, CAM_HEIGHT)
    A = jnp.array([[F, 0.0, W_IMG / 2.0],
                   [0.0, F, H_IMG / 2.0],
                   [0.0, 0.0, 1.0]], jnp.float32)
    xyz = jnp.stack([wx, wz, wy], -1)
    res = xyz @ A.T
    uv = res[:, :2] / res[:, -1:]
    uv = uv.at[:, 0].set(jnp.clip(uv[:, 0], 0.0, W_IMG))
    uv = uv.at[:, 1].set(jnp.clip(uv[:, 1], 0.0, H_IMG))
    return uv.reshape(world.shape)


if __name__ == "__main__":
    key = jax.random.PRNGKey(0)
    # small batched map-coordinate grid: (batch=2, 8, 8, 2) pixel coords in [0, map_size)
    map_coords = jax.random.uniform(
        key, (2, 8, 8, 2), dtype=jnp.float32, minval=0.0, maxval=float(MAP_SIZE))

    out = jax.block_until_ready(converter_forward(map_coords))
    ref = jax.block_until_ready(_reference_forward(map_coords))

    assert out.shape == map_coords.shape
    np.testing.assert_allclose(np.asarray(out), np.asarray(ref), rtol=1e-5, atol=1e-4)

    # Larger sanity run to exercise the multi-block / megacore path.
    big = jax.random.uniform(
        jax.random.PRNGKey(1), (4, 256, 256, 2), dtype=jnp.float32,
        minval=0.0, maxval=float(MAP_SIZE))
    out_big = jax.block_until_ready(converter_forward(big))
    ref_big = jax.block_until_ready(_reference_forward(big))
    np.testing.assert_allclose(np.asarray(out_big), np.asarray(ref_big),
                               rtol=1e-5, atol=1e-4)

    print("KERNEL_OK")
</pallas_src>

<mosaic_0001>
module attributes {stable_mosaic.version = 11 : i64} {
  func.func @_converter_kernel(%arg0: i32, %arg1: memref<2x8x128xf32, #tpu.memory_space<vmem>>, %arg2: memref<2x8x128xf32, #tpu.memory_space<vmem>>) attributes {dimension_semantics = [#tpu.dimension_semantics<parallel>], iteration_bounds = array<i64: 1>, scalar_prefetch = 0 : i64, scratch_operands = 0 : i64, tpu.core_type = #tpu.core_type<tc>, window_params = [{transform_indices = @transform_0, window_bounds = array<i64: 2, 8, 128>}, {transform_indices = @transform_1, window_bounds = array<i64: 2, 8, 128>}]} {
    %c0 = arith.constant 0 : index
    %c0_0 = arith.constant 0 : index
    %c0_1 = arith.constant 0 : index
    %0 = vector.load %arg1[%c0, %c0_0, %c0_1] : memref<2x8x128xf32, #tpu.memory_space<vmem>>, vector<1x8x128xf32>
    %1 = vector.shape_cast %0 : vector<1x8x128xf32> to vector<8x128xf32>
    %c1 = arith.constant 1 : index
    %c0_2 = arith.constant 0 : index
    %c0_3 = arith.constant 0 : index
    %2 = vector.load %arg1[%c1, %c0_2, %c0_3] : memref<2x8x128xf32, #tpu.memory_space<vmem>>, vector<1x8x128xf32>
    %3 = vector.shape_cast %2 : vector<1x8x128xf32> to vector<8x128xf32>
    %cst = arith.constant 9.600000e+01 : f32
    %4 = vector.broadcast %cst : f32 to vector<8x128xf32>
    %5 = arith.subf %1, %4 : vector<8x128xf32>
    %cst_4 = arith.constant 2.000000e-01 : f32
    %6 = vector.broadcast %cst_4 : f32 to vector<8x128xf32>
    %7 = arith.mulf %5, %6 : vector<8x128xf32>
    %cst_5 = arith.constant 1.920000e+02 : f32
    %8 = vector.broadcast %cst_5 : f32 to vector<8x128xf32>
    %9 = arith.subf %8, %3 : vector<8x128xf32>
    %cst_6 = arith.constant 2.000000e-01 : f32
    %10 = vector.broadcast %cst_6 : f32 to vector<8x128xf32>
    %11 = arith.mulf %9, %10 : vector<8x128xf32>
    %cst_7 = arith.constant 3.000000e+00 : f32
    %12 = vector.broadcast %cst_7 : f32 to vector<8x128xf32>
    %13 = arith.addf %11, %12 : vector<8x128xf32>
    %cst_8 = arith.constant 1.000000e+00 : f32
    %14 = vector.broadcast %cst_8 : f32 to vector<8x128xf32>
    %15 = arith.divf %14, %13 : vector<8x128xf32>
    %cst_9 = arith.constant 1.920000e+02 : f32
    %16 = vector.broadcast %cst_9 : f32 to vector<8x128xf32>
    %17 = arith.mulf %16, %7 : vector<8x128xf32>
    %cst_10 = arith.constant 1.920000e+02 : f32
    %18 = vector.broadcast %cst_10 : f32 to vector<8x128xf32>
    %19 = arith.mulf %18, %13 : vector<8x128xf32>
    %20 = arith.addf %17, %19 : vector<8x128xf32>
    %cst_11 = arith.constant 8.000000e+01 : f32
    %21 = vector.broadcast %cst_11 : f32 to vector<8x128xf32>
    %22 = arith.mulf %21, %13 : vector<8x128xf32>
    %cst_12 = arith.constant 2.688000e+02 : f32
    %23 = vector.broadcast %cst_12 : f32 to vector<8x128xf32>
    %24 = arith.addf %23, %22 : vector<8x128xf32>
    %25 = arith.mulf %20, %15 : vector<8x128xf32>
    %cst_13 = arith.constant 0.000000e+00 : f32
    %cst_14 = arith.constant 3.840000e+02 : f32
    %26 = vector.broadcast %cst_13 : f32 to vector<8x128xf32>
    %27 = arith.maximumf %26, %25 : vector<8x128xf32>
    %28 = vector.broadcast %cst_14 : f32 to vector<8x128xf32>
    %29 = arith.minimumf %28, %27 : vector<8x128xf32>
    %c0_15 = arith.constant 0 : index
    %c0_16 = arith.constant 0 : index
    %c0_17 = arith.constant 0 : index
    %30 = vector.load %arg2[%c0_15, %c0_16, %c0_17] : memref<2x8x128xf32, #tpu.memory_space<vmem>>, vector<1x8x128xf32>
    %31 = vector.shape_cast %30 : vector<1x8x128xf32> to vector<8x128xf32>
    %32 = vector.shape_cast %29 : vector<8x128xf32> to vector<1x8x128xf32>
    tpu.vector_store %arg2[%c0_15, %c0_16, %c0_17], %32 {strides = array<i32>} : memref<2x8x128xf32, #tpu.memory_space<vmem>>, vector<1x8x128xf32>,
    %33 = arith.mulf %24, %15 : vector<8x128xf32>
    %cst_18 = arith.constant 0.000000e+00 : f32
    %cst_19 = arith.constant 1.600000e+02 : f32
    %34 = vector.broadcast %cst_18 : f32 to vector<8x128xf32>
    %35 = arith.maximumf %34, %33 : vector<8x128xf32>
    %36 = vector.broadcast %cst_19 : f32 to vector<8x128xf32>
    %37 = arith.minimumf %36, %35 : vector<8x128xf32>
    %c1_20 = arith.constant 1 : index
    %c0_21 = arith.constant 0 : index
    %c0_22 = arith.constant 0 : index
    %38 = vector.load %arg2[%c1_20, %c0_21, %c0_22] : memref<2x8x128xf32, #tpu.memory_space<vmem>>, vector<1x8x128xf32>
    %39 = vector.shape_cast %38 : vector<1x8x128xf32> to vector<8x128xf32>
    %40 = vector.shape_cast %37 : vector<8x128xf32> to vector<1x8x128xf32>
    tpu.vector_store %arg2[%c1_20, %c0_21, %c0_22], %40 {strides = array<i32>} : memref<2x8x128xf32, #tpu.memory_space<vmem>>, vector<1x8x128xf32>,
    return
  }
  func.func @transform_0(%arg0: i32) -> (i32, i32, i32) {
    %c0_i32 = arith.constant 0 : i32
    %c0_i32_0 = arith.constant 0 : i32
    %c0_i32_1 = arith.constant 0 : i32
    return %c0_i32, %arg0, %c0_i32_0 : i32, i32, i32
  }
  func.func @transform_1(%arg0: i32) -> (i32, i32, i32) {
    %c0_i32 = arith.constant 0 : i32
    %c0_i32_0 = arith.constant 0 : i32
    %c0_i32_1 = arith.constant 0 : i32
    return %c0_i32, %arg0, %c0_i32_0 : i32, i32, i32
  }
}

</mosaic_0001>

<bundles_post_ra>
// kernel: converter_forward.1
= control target key start
LH: loop header
LB: loop body
LE: loop exit
PB: predicated region body
PF: predicated region fallthrough
CT: control target
= control target key end

     0   :  { %s63_s0 = inlined_call_operand.vmem [shape: f32[2,8,128], index: 0, kind: input, shape index: {}]   ;;  %s64_s1 = inlined_call_operand.vmem [shape: f32[2,8,128], index: 1, kind: output, shape index: {}]  }
   0x1   :  { %v8_v0 = vld [vmem:[%s63_s0] sm:$0xff]  ;;  %v36_v1 = vld [vmem:[%s63_s0 + $0x8] sm:$0xff] }
   0x2   :  { %v13_v2 = vsub.f32 192.0, %v36_v1  ;;  %v37_v3 = vadd.f32 -96.0, %v8_v0 }
   0x4   :  { %v14_v4 = vmul.f32 0.2, %v13_v2  ;;  %v12_v6 = vmul.f32 0.2, %v37_v3 }
   0x6   :  { %v15_v5 = vadd.f32 3.0, %v14_v4  ;;  %v18_v7 = vmul.f32 192.0, %v12_v6 }
   0x8   :  { %39 = vrcp.f32 %v15_v5  ;;  %v19_v8 = vmul.f32 192.0, %v15_v5  ;;  %v21_v9 = vmul.f32 80.0, %v15_v5 }
   0xa   :  { %v20_v10 = vadd.f32 %v19_v8, %v18_v7  ;;  %v22_v11 = vadd.f32 268.8, %v21_v9 }
  0x12   :  { %v40_v12 = vpop.eup %39 }
  0x13   :  { %v23_v13 = vmul.f32 %v40_v12, %v20_v10  ;;  %v27_v14 = vmul.f32 %v40_v12, %v22_v11 }
  0x15   :  { %v24_v15 = vmax.f32 %v23_v13, 0.0  ;;  %v28_v16 = vmax.f32 %v27_v14, 0.0 }
  0x17   :  { %v25_v17 = vmin.f32 %v24_v15, 384.0  ;;  %v29_v18 = vmin.f32 %v28_v16, 160.0 }
  0x19   :  { %26 = vst [vmem:[%s64_s1] sm:$0xff] %v25_v17  ;;  %38 = vst [vmem:[%s64_s1 + $0x8] sm:$0xff] %v29_v18 }

</bundles_post_ra>
